<compile_context>
chip_gen: v5e
topology: v5e:2x2
jax: 0.10.0
libtpu: 0.0.40
codegen_flags: <defaults>
</compile_context>

<pallas_src>
import jax
import jax.numpy as jnp
from jax.experimental import pallas as pl
from jax.experimental.pallas import tpu as pltpu

NUM_CLASSES = 3
FEAT = 512
NCLS_PAD = 16       # class dim padded to one bf16 sublane tile (16), not 128 lanes
SUBLANE = 8         # f32 sublane tile


def _make_head_kernel(valid_rows):
    """fc2(relu(fc1(x))) for the fused (both-branch) batch, entirely in VMEM.

    x_ref   : [M_PAD, 512]  bf16 feature rows (x1 rows then x2 rows, zero-padded)
    w1_ref  : [512, 512]    bf16 fc1 weight, stored (in, out) so h = x @ W1
    b1_ref  : [1, 512]      f32
    w2t_ref : [16, 512]     bf16 fc2 weight, stored TRANSPOSED (out_pad, in)
    b2_ref  : [1, 16]       f32, zero-padded beyond col 3
    o_ref   : [M_PAD, 16]   f32 (padded rows written as zero)
    """
    def kernel(x_ref, w1_ref, b1_ref, w2t_ref, b2_ref, o_ref):
        x = x_ref[...]
        # fc1 (MXU, bf16 in / f32 accumulate) + bias + relu (VPU, f32)
        h = jnp.dot(x, w1_ref[...], preferred_element_type=jnp.float32) + b1_ref[...]
        h = jnp.maximum(h, 0.0)
        # fc2: contract the 512 dim of h with the 512 dim of the transposed weight
        # (lane-dense [16, 512] operand; no 128-lane padding fetched from HBM).
        logits = jax.lax.dot_general(
            h.astype(jnp.bfloat16), w2t_ref[...],
            dimension_numbers=(((1,), (1,)), ((), ())),
            preferred_element_type=jnp.float32,
        ) + b2_ref[...]
        # Zero the padded batch rows so the padded output is safe to consume as-is.
        row = jax.lax.broadcasted_iota(jnp.int32, logits.shape, 0)
        o_ref[...] = jnp.where(row < valid_rows, logits, 0.0)
    return kernel


def prepare_params(w1, b1, w2, b2):
    """One-time prep: bf16 weight copies; fc2 stored transposed & minimally padded."""
    w1_bf = w1.astype(jnp.bfloat16)                                        # [512, 512]
    b1_f = b1.reshape(1, FEAT).astype(jnp.float32)                         # [1, 512]
    w2t = jnp.zeros((NCLS_PAD, FEAT), jnp.float32).at[:NUM_CLASSES, :].set(
        w2.reshape(FEAT, NUM_CLASSES).T)
    w2t_bf = w2t.astype(jnp.bfloat16)                                      # [16, 512]
    b2_pad = jnp.zeros((1, NCLS_PAD), jnp.float32).at[:, :NUM_CLASSES].set(
        b2.reshape(1, NUM_CLASSES))                                        # [1, 16]
    return w1_bf, b1_f, w2t_bf, b2_pad


def _siamese_forward(x1_nchw, x2_nchw, params):
    """Full forward: flatten (base_encoder modeled as identity) + fused Pallas head."""
    w1_bf, b1_f, w2t_bf, b2_pad = params
    B = x1_nchw.shape[0]

    # base_encoder + x.view(B, -1)  (plain-JAX glue), fuse both branches into one batch.
    x1 = x1_nchw.reshape(B, -1)
    x2 = x2_nchw.reshape(B, -1)
    assert x1.shape[1] == FEAT, f"flattened features must be {FEAT}, got {x1.shape[1]}"
    x = jnp.concatenate([x1, x2], axis=0).astype(jnp.bfloat16)             # [2B, 512]

    m = 2 * B
    m_pad = max(SUBLANE, pl.cdiv(m, SUBLANE) * SUBLANE)                    # sublane-dense
    x = jnp.pad(x, ((0, m_pad - m), (0, 0)))                               # [m_pad, 512]

    cost = pl.CostEstimate(
        flops=2 * m_pad * FEAT * FEAT + 2 * m_pad * FEAT * NCLS_PAD,
        transcendentals=0,
        bytes_accessed=(w1_bf.size * 2 + w2t_bf.size * 2
                        + b1_f.size * 4 + b2_pad.size * 4
                        + x.size * 2 + m_pad * NCLS_PAD * 4),
    )

    full = lambda shape: pl.BlockSpec(shape, lambda i: (0, 0))

    out = pl.pallas_call(
        _make_head_kernel(m),
        grid=(1,),
        in_specs=[
            full((m_pad, FEAT)),       # fused x, bf16
            full((FEAT, FEAT)),        # w1 (in, out), bf16
            full((1, FEAT)),           # b1, f32
            full((NCLS_PAD, FEAT)),    # w2 transposed (out_pad, in), bf16
            full((1, NCLS_PAD)),       # b2 padded, f32
        ],
        out_specs=full((m_pad, NCLS_PAD)),
        out_shape=jax.ShapeDtypeStruct((m_pad, NCLS_PAD), jnp.float32),
        compiler_params=pltpu.CompilerParams(
            dimension_semantics=("arbitrary",)),
        cost_estimate=cost,
    )(x, w1_bf, b1_f, w2t_bf, b2_pad)

    out1 = out[:B, :NUM_CLASSES]
    out2 = out[B:2 * B, :NUM_CLASSES]
    return out1, out2


siamese_forward = jax.jit(_siamese_forward)


def init_params(key):
    """Deterministic PyTorch-Linear-style init. Weights stored as (in, out), f32."""
    k1, k2, k3, k4 = jax.random.split(key, 4)
    bound1 = 1.0 / jnp.sqrt(FEAT)
    w1 = jax.random.uniform(k1, (FEAT, FEAT), jnp.float32, -bound1, bound1)
    b1 = jax.random.uniform(k2, (1, FEAT), jnp.float32, -bound1, bound1)
    bound2 = 1.0 / jnp.sqrt(FEAT)
    w2 = jax.random.uniform(k3, (FEAT, NUM_CLASSES), jnp.float32, -bound2, bound2)
    b2 = jax.random.uniform(k4, (1, NUM_CLASSES), jnp.float32, -bound2, bound2)
    return w1, b1, w2, b2


if __name__ == "__main__":
    key = jax.random.PRNGKey(0)
    kx1, kx2, kp = jax.random.split(key, 3)

    # Small NCHW inputs: batch=2, channels=2, spatial=16 -> 2*16*16 = 512 features.
    x1 = jax.random.normal(kx1, (2, 2, 16, 16), jnp.float32)
    x2 = jax.random.normal(kx2, (2, 2, 16, 16), jnp.float32)
    w1, b1, w2, b2 = init_params(kp)
    params = prepare_params(w1, b1, w2, b2)

    out1, out2 = siamese_forward(x1, x2, params)
    jax.block_until_ready((out1, out2))

    # Pure-JAX reference emulating the kernel's bf16 matmul inputs / f32 accumulation.
    def ref_one(x):
        f = x.reshape(x.shape[0], -1)
        f_bf = f.astype(jnp.bfloat16).astype(jnp.float32)
        w1_f = w1.astype(jnp.bfloat16).astype(jnp.float32)
        w2_f = w2.astype(jnp.bfloat16).astype(jnp.float32)
        h = jnp.maximum(f_bf @ w1_f + b1, 0.0)
        h_bf = h.astype(jnp.bfloat16).astype(jnp.float32)
        return h_bf @ w2_f + b2

    r1, r2 = ref_one(x1), ref_one(x2)
    assert out1.shape == (2, NUM_CLASSES) and out2.shape == (2, NUM_CLASSES)
    assert jnp.allclose(out1, r1, atol=1e-2, rtol=1e-2)
    assert jnp.allclose(out2, r2, atol=1e-2, rtol=1e-2)

    print("KERNEL_OK")
</pallas_src>

<mosaic_0001>
module attributes {stable_mosaic.version = 11 : i64} {
  func.func @kernel(%arg0: i32, %arg1: memref<8x512xbf16, #tpu.memory_space<vmem>>, %arg2: memref<512x512xbf16, #tpu.memory_space<vmem>>, %arg3: memref<1x512xf32, #tpu.memory_space<vmem>>, %arg4: memref<16x512xbf16, #tpu.memory_space<vmem>>, %arg5: memref<1x16xf32, #tpu.memory_space<vmem>>, %arg6: memref<8x16xf32, #tpu.memory_space<vmem>>) attributes {dimension_semantics = [#tpu.dimension_semantics<arbitrary>], iteration_bounds = array<i64: 1>, scalar_prefetch = 0 : i64, scratch_operands = 0 : i64, tpu.core_type = #tpu.core_type<tc>, window_params = [{pipeline_mode = #tpu.pipeline_mode<synchronous>, transform_indices = @transform_0, window_bounds = array<i64: 8, 512>}, {pipeline_mode = #tpu.pipeline_mode<synchronous>, transform_indices = @transform_1, window_bounds = array<i64: 512, 512>}, {pipeline_mode = #tpu.pipeline_mode<synchronous>, transform_indices = @transform_2, window_bounds = array<i64: 1, 512>}, {pipeline_mode = #tpu.pipeline_mode<synchronous>, transform_indices = @transform_3, window_bounds = array<i64: 16, 512>}, {pipeline_mode = #tpu.pipeline_mode<synchronous>, transform_indices = @transform_4, window_bounds = array<i64: 1, 16>}, {pipeline_mode = #tpu.pipeline_mode<synchronous>, transform_indices = @transform_5, window_bounds = array<i64: 8, 16>}]} {
    %c0 = arith.constant 0 : index
    %c0_0 = arith.constant 0 : index
    %0 = vector.load %arg1[%c0, %c0_0] : memref<8x512xbf16, #tpu.memory_space<vmem>>, vector<8x512xbf16>
    %c0_1 = arith.constant 0 : index
    %c0_2 = arith.constant 0 : index
    %1 = vector.load %arg2[%c0_1, %c0_2] : memref<512x512xbf16, #tpu.memory_space<vmem>>, vector<512x512xbf16>
    %cst = arith.constant dense<0.000000e+00> : vector<8x512xf32>
    %2 = tpu.matmul %0, %1, %cst {dimension_numbers = #tpu.dot_dimension_numbers<[1], [0], [0], [1], [0, 0, 1, 1], [], []>} : vector<8x512xbf16>, vector<512x512xbf16>, vector<8x512xf32> -> vector<8x512xf32>
    %c0_3 = arith.constant 0 : index
    %c0_4 = arith.constant 0 : index
    %3 = vector.load %arg3[%c0_3, %c0_4] : memref<1x512xf32, #tpu.memory_space<vmem>>, vector<1x512xf32>
    %4 = vector.broadcast %3 : vector<1x512xf32> to vector<8x512xf32>
    %5 = arith.addf %2, %4 : vector<8x512xf32>
    %cst_5 = arith.constant 0.000000e+00 : f32
    %6 = vector.broadcast %cst_5 : f32 to vector<8x512xf32>
    %7 = arith.maximumf %5, %6 : vector<8x512xf32>
    %8 = arith.truncf %7 : vector<8x512xf32> to vector<8x512xbf16>
    %c0_6 = arith.constant 0 : index
    %c0_7 = arith.constant 0 : index
    %9 = vector.load %arg4[%c0_6, %c0_7] : memref<16x512xbf16, #tpu.memory_space<vmem>>, vector<16x512xbf16>
    %cst_8 = arith.constant dense<0.000000e+00> : vector<8x16xf32>
    %10 = tpu.matmul %8, %9, %cst_8 {dimension_numbers = #tpu.dot_dimension_numbers<[1], [1], [0], [0], [0, 0, 1, 0], [], []>} : vector<8x512xbf16>, vector<16x512xbf16>, vector<8x16xf32> -> vector<8x16xf32>
    %c0_9 = arith.constant 0 : index
    %c0_10 = arith.constant 0 : index
    %11 = vector.load %arg5[%c0_9, %c0_10] : memref<1x16xf32, #tpu.memory_space<vmem>>, vector<1x16xf32>
    %12 = vector.broadcast %11 : vector<1x16xf32> to vector<8x16xf32>
    %13 = arith.addf %10, %12 : vector<8x16xf32>
    %14 = tpu.iota {dimensions = array<i32: 0>} : vector<8x16xi32>
    %c4_i32 = arith.constant 4 : i32
    %15 = vector.broadcast %c4_i32 : i32 to vector<8x16xi32>
    %16 = arith.cmpi slt, %14, %15 : vector<8x16xi32>
    %cst_11 = arith.constant 0.000000e+00 : f32
    %17 = vector.broadcast %cst_11 : f32 to vector<8x16xf32>
    %18 = arith.select %16, %13, %17 : vector<8x16xi1>, vector<8x16xf32>
    %c0_12 = arith.constant 0 : index
    %c0_13 = arith.constant 0 : index
    %19 = vector.load %arg6[%c0_12, %c0_13] : memref<8x16xf32, #tpu.memory_space<vmem>>, vector<8x16xf32>
    tpu.vector_store %arg6[%c0_12, %c0_13], %18 {strides = array<i32>} : memref<8x16xf32, #tpu.memory_space<vmem>>, vector<8x16xf32>,
    return
  }
  func.func @transform_0(%arg0: i32) -> (i32, i32) {
    %c0_i32 = arith.constant 0 : i32
    %c0_i32_0 = arith.constant 0 : i32
    %c0_i32_1 = arith.constant 0 : i32
    return %c0_i32, %c0_i32_0 : i32, i32
  }
  func.func @transform_1(%arg0: i32) -> (i32, i32) {
    %c0_i32 = arith.constant 0 : i32
    %c0_i32_0 = arith.constant 0 : i32
    %c0_i32_1 = arith.constant 0 : i32
    return %c0_i32, %c0_i32_0 : i32, i32
  }
  func.func @transform_2(%arg0: i32) -> (i32, i32) {
    %c0_i32 = arith.constant 0 : i32
    %c0_i32_0 = arith.constant 0 : i32
    %c0_i32_1 = arith.constant 0 : i32
    return %c0_i32, %c0_i32_0 : i32, i32
  }
  func.func @transform_3(%arg0: i32) -> (i32, i32) {
    %c0_i32 = arith.constant 0 : i32
    %c0_i32_0 = arith.constant 0 : i32
    %c0_i32_1 = arith.constant 0 : i32
    return %c0_i32, %c0_i32_0 : i32, i32
  }
  func.func @transform_4(%arg0: i32) -> (i32, i32) {
    %c0_i32 = arith.constant 0 : i32
    %c0_i32_0 = arith.constant 0 : i32
    %c0_i32_1 = arith.constant 0 : i32
    return %c0_i32, %c0_i32_0 : i32, i32
  }
  func.func @transform_5(%arg0: i32) -> (i32, i32) {
    %c0_i32 = arith.constant 0 : i32
    %c0_i32_0 = arith.constant 0 : i32
    %c0_i32_1 = arith.constant 0 : i32
    return %c0_i32, %c0_i32_0 : i32, i32
  }
}

</mosaic_0001>

<bundles_post_ra>
// kernel: _siamese_forward.1
= control target key start
LH: loop header
LB: loop body
LE: loop exit
PB: predicated region body
PF: predicated region fallthrough
CT: control target
= control target key end

     0   :  { %10 = vsyncpa [#allocation3], 0  ;;  %s1828_s21 = smov [#allocation2]   ;;  %s1829_s23 = smov 256   ;;  %s1933_s0 = inlined_call_operand.vmem [shape: bf16[8,512], index: 0, kind: input, shape index: {}]   ;;  %s1934_s1 = inlined_call_operand.hbm [shape: bf16[512,512], index: 1, kind: input, shape index: {}]   ;;  %s1935_s2 = inlined_call_operand.vmem [shape: f32[1,512], index: 2, kind: input, shape index: {}]   ;;  %s1936_s3 = inlined_call_operand.vmem [shape: bf16[16,512], index: 3, kind: input, shape index: {}]   ;;  %s1937_s4 = inlined_call_operand.vmem [shape: f32[1,16], index: 4, kind: input, shape index: {}]   ;;  %s1938_s5 = inlined_call_operand.vmem [shape: f32[8,16], index: 5, kind: output, shape index: {}]  }
   0x1   :  { %s17_s20 = sshll.u32 %s1934_s1, 4  ;;  %s19_s22 = sshll.u32 %s1828_s21, 4  ;;  %s18_s20 = int_to_ptr.hbm [resolvable:$true] %s17_s20  ;;  %s20_s22 = int_to_ptr.vmem [resolvable:$true] %s19_s22 }
   0x2   :  { %s1830_s24 = smov 16  }
   0x3   :  { %25 = dma.hbm_to_vmem [thread:$0]  %s18_s20, 16384, %s20_s22, [#allocation3], %s1829_s23, %s1829_s23, %s1830_s24  }
   0x4   :  { %1826 = dma.done.wait [#allocation3], 16384  }
   0x5   :  { %1827 = vsyncadd [#allocation3], 4294950912  ;;  %v1252_v0 = vld [vmem:[#allocation2 + $0xe0] sm:$0xf]  ;;  %v1696_v1 = vld [vmem:[#allocation2 + $0xec] sm:$0xf0] }
   0x6   :  { %v1380_v2 = vld [vmem:[#allocation2 + $0x1e0] sm:$0xf]  ;;  %v1253_v3 = vor.u32 %v1696_v1, %v1252_v0  ;;  %v1728_v4 = vld [vmem:[#allocation2 + $0x1ec] sm:$0xf0]  ;;  %vm1131_vm1 = vcmask 130048  }
   0x7   :  { %v1508_v5 = vld [vmem:[#allocation2 + $0x2e0] sm:$0xf]  ;;  %v1760_v6 = vld [vmem:[#allocation2 + $0x2ec] sm:$0xf0]  ;;  %v1381_v7 = vor.u32 %v1728_v4, %v1380_v2 }
   0x8   :  { %v1509_v8 = vor.u32 %v1760_v6, %v1508_v5  ;;  %v1636_v9 = vld [vmem:[#allocation2 + $0x3e0] sm:$0xf]  ;;  %v1792_v10 = vld [vmem:[#allocation2 + $0x3ec] sm:$0xf0]  ;;  %831 = vmatpush.bf16.msra.mxu0 %v1253_v3 }
   0x9   :  { %v1236_v11 = vld [vmem:[#allocation2 + $0xc0] sm:$0xf]  ;;  %v1637_v12 = vor.u32 %v1792_v10, %v1636_v9  ;;  %v1692_v13 = vld [vmem:[#allocation2 + $0xcc] sm:$0xf0]  ;;  %844 = vmatpush.bf16.msra.mxu1 %v1381_v7 }
   0xa   :  { %v1364_v14 = vld [vmem:[#allocation2 + $0x1c0] sm:$0xf]  ;;  %v1724_v15 = vld [vmem:[#allocation2 + $0x1cc] sm:$0xf0]  ;;  %857 = vmatpush.bf16.msra.mxu2 %v1509_v8  ;;  %v1237_v16 = vor.u32 %v1692_v13, %v1236_v11 }
   0xb   :  { %v1365_v17 = vor.u32 %v1724_v15, %v1364_v14  ;;  %v1492_v18 = vld [vmem:[#allocation2 + $0x2c0] sm:$0xf]  ;;  %v1756_v19 = vld [vmem:[#allocation2 + $0x2cc] sm:$0xf0]  ;;  %870 = vmatpush.bf16.msra.mxu3 %v1637_v12 }
   0xc   :  { %v1620_v20 = vld [vmem:[#allocation2 + $0x3c0] sm:$0xf]  ;;  %v1493_v21 = vor.u32 %v1756_v19, %v1492_v18  ;;  %v1788_v22 = vld [vmem:[#allocation2 + $0x3cc] sm:$0xf0]  ;;  %832 = vmatpush.bf16.msra.mxu0 %v1237_v16 }
   0xd   :  { %v1220_v23 = vld [vmem:[#allocation2 + $0xa0] sm:$0xf]  ;;  %v1688_v24 = vld [vmem:[#allocation2 + $0xac] sm:$0xf0]  ;;  %v1621_v25 = vor.u32 %v1788_v22, %v1620_v20  ;;  %845 = vmatpush.bf16.msra.mxu1 %v1365_v17 }
   0xe   :  { %v1348_v26 = vld [vmem:[#allocation2 + $0x1a0] sm:$0xf]  ;;  %v1720_v27 = vld [vmem:[#allocation2 + $0x1ac] sm:$0xf0]  ;;  %v1221_v29 = vor.u32 %v1688_v24, %v1220_v23  ;;  %858 = vmatpush.bf16.msra.mxu2 %v1493_v21 }
   0xf   :  { %v1476_v28 = vld [vmem:[#allocation2 + $0x2a0] sm:$0xf]  ;;  %v1752_v30 = vld [vmem:[#allocation2 + $0x2ac] sm:$0xf0]  ;;  %v1349_v33 = vor.u32 %v1720_v27, %v1348_v26  ;;  %871 = vmatpush.bf16.msra.mxu3 %v1621_v25 }
  0x10   :  { %v1604_v31 = vld [vmem:[#allocation2 + $0x3a0] sm:$0xf]  ;;  %v1784_v32 = vld [vmem:[#allocation2 + $0x3ac] sm:$0xf0]  ;;  %v1477_v34 = vor.u32 %v1752_v30, %v1476_v28  ;;  %833 = vmatpush.bf16.msra.mxu0 %v1221_v29  ;;  %v1694_v28 = vld [vmem:[#allocation2 + $0xe4] sm:$0xf] }
  0x11   :  { %v1204_v35 = vld [vmem:[#allocation2 + $0x80] sm:$0xf]  ;;  %v1684_v36 = vld [vmem:[#allocation2 + $0x8c] sm:$0xf0]  ;;  %v1605_v38 = vor.u32 %v1784_v32, %v1604_v31  ;;  %846 = vmatpush.bf16.msra.mxu1 %v1349_v33  ;;  %v1254_v29 = vld [vmem:[#allocation2 + $0xf0] sm:$0xf0] }
  0x12   :  { %v1332_v37 = vld [vmem:[#allocation2 + $0x180] sm:$0xf]  ;;  %v1716_v39 = vld [vmem:[#allocation2 + $0x18c] sm:$0xf0]  ;;  %v1205_v44 = vor.u32 %v1684_v36, %v1204_v35  ;;  %859 = vmatpush.bf16.msra.mxu2 %v1477_v34  ;;  %v1726_v30 = vld [vmem:[#allocation2 + $0x1e4] sm:$0xf] }
  0x13   :  { %v1460_v40 = vld [vmem:[#allocation2 + $0x280] sm:$0xf]  ;;  %v1748_v41 = vld [vmem:[#allocation2 + $0x28c] sm:$0xf0]  ;;  %v1333_v45 = vor.u32 %v1716_v39, %v1332_v37  ;;  %872 = vmatpush.bf16.msra.mxu3 %v1605_v38  ;;  %v1382_v32 = vld [vmem:[#allocation2 + $0x1f0] sm:$0xf0] }
  0x14   :  { %v1588_v42 = vld [vmem:[#allocation2 + $0x380] sm:$0xf]  ;;  %v1780_v43 = vld [vmem:[#allocation2 + $0x38c] sm:$0xf0]  ;;  %v1461_v46 = vor.u32 %v1748_v41, %v1460_v40  ;;  %834 = vmatpush.bf16.msra.mxu0 %v1205_v44  ;;  %v1758_v33 = vld [vmem:[#allocation2 + $0x2e4] sm:$0xf]  ;;  %v1257_v40 = vor.u32 %v1694_v28, %v1254_v29  ;;  %v1385_v41 = vor.u32 %v1726_v30, %v1382_v32 }
  0x15   :  { %v1188_v47 = vld [vmem:[#allocation2 + $0x60] sm:$0xf]  ;;  %v1680_v48 = vld [vmem:[#allocation2 + $0x6c] sm:$0xf0]  ;;  %v1589_v50 = vor.u32 %v1780_v43, %v1588_v42  ;;  %847 = vmatpush.bf16.msra.mxu1 %v1333_v45  ;;  %v1510_v34 = vld [vmem:[#allocation2 + $0x2f0] sm:$0xf0] }
  0x16   :  { %v1316_v49 = vld [vmem:[#allocation2 + $0x160] sm:$0xf]  ;;  %v1712_v51 = vld [vmem:[#allocation2 + $0x16c] sm:$0xf0]  ;;  %v1189_v56 = vor.u32 %v1680_v48, %v1188_v47  ;;  %860 = vmatpush.bf16.msra.mxu2 %v1461_v46  ;;  %v1790_v37 = vld [vmem:[#allocation2 + $0x3e4] sm:$0xf]  ;;  %v1513_v42 = vor.u32 %v1758_v33, %v1510_v34 }
  0x17   :  { %v1444_v52 = vld [vmem:[#allocation2 + $0x260] sm:$0xf]  ;;  %v1744_v53 = vld [vmem:[#allocation2 + $0x26c] sm:$0xf0]  ;;  %v1317_v57 = vor.u32 %v1712_v51, %v1316_v49  ;;  %873 = vmatpush.bf16.msra.mxu3 %v1589_v50  ;;  %v1638_v38 = vld [vmem:[#allocation2 + $0x3f0] sm:$0xf0] }
  0x18   :  { %v1572_v54 = vld [vmem:[#allocation2 + $0x360] sm:$0xf]  ;;  %v1776_v55 = vld [vmem:[#allocation2 + $0x36c] sm:$0xf0]  ;;  %v1445_v58 = vor.u32 %v1744_v53, %v1444_v52  ;;  %835 = vmatpush.bf16.msra.mxu0 %v1189_v56  ;;  %v1690_v43 = vld [vmem:[#allocation2 + $0xc4] sm:$0xf]  ;;  %v1641_v46 = vor.u32 %v1790_v37, %v1638_v38 }
  0x19   :  { %v1172_v59 = vld [vmem:[#allocation2 + $0x40] sm:$0xf]  ;;  %v1676_v60 = vld [vmem:[#allocation2 + $0x4c] sm:$0xf0]  ;;  %v1573_v62 = vor.u32 %v1776_v55, %v1572_v54  ;;  %848 = vmatpush.bf16.msra.mxu1 %v1317_v57  ;;  %v1238_v44 = vld [vmem:[#allocation2 + $0xd0] sm:$0xf0] }
  0x1a   :  { %v1300_v61 = vld [vmem:[#allocation2 + $0x140] sm:$0xf]  ;;  %v1708_v63 = vld [vmem:[#allocation2 + $0x14c] sm:$0xf0]  ;;  %v1173_v4 = vor.u32 %v1676_v60, %v1172_v59  ;;  %861 = vmatpush.bf16.msra.mxu2 %v1445_v58  ;;  %v1722_v45 = vld [vmem:[#allocation2 + $0x1c4] sm:$0xf]  ;;  %v1241_v53 = vor.u32 %v1690_v43, %v1238_v44 }
  0x1b   :  { %v1428_v0 = vld [vmem:[#allocation2 + $0x240] sm:$0xf]  ;;  %v1740_v1 = vld [vmem:[#allocation2 + $0x24c] sm:$0xf0]  ;;  %v1301_v5 = vor.u32 %v1708_v63, %v1300_v61  ;;  %874 = vmatpush.bf16.msra.mxu3 %v1573_v62  ;;  %v1366_v47 = vld [vmem:[#allocation2 + $0x1d0] sm:$0xf0] }
  0x1c   :  { %v1556_v2 = vld [vmem:[#allocation2 + $0x340] sm:$0xf]  ;;  %v1772_v3 = vld [vmem:[#allocation2 + $0x34c] sm:$0xf0]  ;;  %v1429_v6 = vor.u32 %v1740_v1, %v1428_v0  ;;  %836 = vmatpush.bf16.msra.mxu0 %v1173_v4  ;;  %v1754_v48 = vld [vmem:[#allocation2 + $0x2c4] sm:$0xf]  ;;  %v1369_v57 = vor.u32 %v1722_v45, %v1366_v47 }
  0x1d   :  { %v1156_v7 = vld [vmem:[#allocation2 + $0x20] sm:$0xf]  ;;  %v1672_v8 = vld [vmem:[#allocation2 + $0x2c] sm:$0xf0]  ;;  %v1557_v10 = vor.u32 %v1772_v3, %v1556_v2  ;;  %849 = vmatpush.bf16.msra.mxu1 %v1301_v5  ;;  %v1494_v49 = vld [vmem:[#allocation2 + $0x2d0] sm:$0xf0] }
  0x1e   :  { %v1284_v9 = vld [vmem:[#allocation2 + $0x120] sm:$0xf]  ;;  %v1704_v11 = vld [vmem:[#allocation2 + $0x12c] sm:$0xf0]  ;;  %v1157_v16 = vor.u32 %v1672_v8, %v1156_v7  ;;  %862 = vmatpush.bf16.msra.mxu2 %v1429_v6  ;;  %v1786_v50 = vld [vmem:[#allocation2 + $0x3c4] sm:$0xf]  ;;  %v1497_v58 = vor.u32 %v1754_v48, %v1494_v49 }
  0x1f   :  { %v1412_v12 = vld [vmem:[#allocation2 + $0x220] sm:$0xf]  ;;  %v1736_v13 = vld [vmem:[#allocation2 + $0x22c] sm:$0xf0]  ;;  %v1285_v19 = vor.u32 %v1704_v11, %v1284_v9  ;;  %875 = vmatpush.bf16.msra.mxu3 %v1557_v10  ;;  %v1622_v51 = vld [vmem:[#allocation2 + $0x3d0] sm:$0xf0] }
  0x20   :  { %v1540_v14 = vld [vmem:[#allocation2 + $0x320] sm:$0xf]  ;;  %v1768_v15 = vld [vmem:[#allocation2 + $0x32c] sm:$0xf0]  ;;  %v1413_v20 = vor.u32 %v1736_v13, %v1412_v12  ;;  %837 = vmatpush.bf16.msra.mxu0 %v1157_v16  ;;  %v38_v52 = vld [vmem:[%s1933_s0 + $0x8] sm:$0xff]  ;;  %v1625_v62 = vor.u32 %v1786_v50, %v1622_v51 }
  0x21   :  { %v1140_v17 = vld [vmem:[#allocation2] sm:$0xf]  ;;  %v1668_v18 = vld [vmem:[#allocation2 + $0xc] sm:$0xf0]  ;;  %v1541_v24 = vor.u32 %v1768_v15, %v1540_v14  ;;  %850 = vmatpush.bf16.msra.mxu1 %v1285_v19  ;;  %v1686_v54 = vld [vmem:[#allocation2 + $0xa4] sm:$0xf]  ;;  %v181_v55 = vunpack.c.l.b16 %v38_v52  ;;  %v182_v56 = vunpack.c.h.b16 %v38_v52 }
  0x22   :  { %v1268_v21 = vld [vmem:[#allocation2 + $0x100] sm:$0xf]  ;;  %v1700_v22 = vld [vmem:[#allocation2 + $0x10c] sm:$0xf0]  ;;  %v1141_v31 = vor.u32 %v1668_v18, %v1140_v17  ;;  %863 = vmatpush.bf16.msra.mxu2 %v1413_v20  ;;  %v1222_v59 = vld [vmem:[#allocation2 + $0xb0] sm:$0xf0] }
  0x23   :  { %v1396_v23 = vld [vmem:[#allocation2 + $0x200] sm:$0xf]  ;;  %v1732_v25 = vld [vmem:[#allocation2 + $0x20c] sm:$0xf0]  ;;  %v1269_v35 = vor.u32 %v1700_v22, %v1268_v21  ;;  %876 = vmatpush.bf16.msra.mxu3 %v1541_v24  ;;  %v1718_v60 = vld [vmem:[#allocation2 + $0x1a4] sm:$0xf]  ;;  %v1867_v1 = vpack.c.b16 %v181_v55, %v181_v55  ;;  %v1872_v6 = vpack.c.b16 %v182_v56, %v182_v56  ;;  %v1225_v8 = vor.u32 %v1686_v54, %v1222_v59 }
  0x24   :  { %v1524_v26 = vld [vmem:[#allocation2 + $0x300] sm:$0xf]  ;;  %v1764_v27 = vld [vmem:[#allocation2 + $0x30c] sm:$0xf0]  ;;  %v1397_v36 = vor.u32 %v1732_v25, %v1396_v23  ;;  %838 = vmatpush.bf16.msra.mxu0 %v1141_v31  ;;  %v1350_v61 = vld [vmem:[#allocation2 + $0x1b0] sm:$0xf0] }
  0x25   :  { %v1525_v39 = vor.u32 %v1764_v27, %v1524_v26  ;;  %851 = vmatpush.bf16.msra.mxu1 %v1269_v35  ;;  %v1750_v63 = vld [vmem:[#allocation2 + $0x2a4] sm:$0xf]  ;;  %v1478_v0 = vld [vmem:[#allocation2 + $0x2b0] sm:$0xf0]  ;;  %v1353_v9 = vor.u32 %v1718_v60, %v1350_v61 }
  0x26   :  { %864 = vmatpush.bf16.msra.mxu2 %v1397_v36  ;;  %v37_v2 = vld [vmem:[%s1933_s0] sm:$0xff]  ;;  %v1606_v4 = vld [vmem:[#allocation2 + $0x3b0] sm:$0xf0]  ;;  %v1481_v10 = vor.u32 %v1750_v63, %v1478_v0 }
  0x27   :  { %877 = vmatpush.bf16.msra.mxu3 %v1525_v39  ;;  %v1782_v3 = vld [vmem:[#allocation2 + $0x3a4] sm:$0xf]  ;;  %v179_v5 = vunpack.c.l.b16 %v37_v2  ;;  %v180_v7 = vunpack.c.h.b16 %v37_v2  ;;  %v1206_v12 = vld [vmem:[#allocation2 + $0x90] sm:$0xf0] }
  0x28   :  { %883 = vmatpush.bf16.msrb.mxu0 %v1257_v40  ;;  %v1682_v11 = vld [vmem:[#allocation2 + $0x84] sm:$0xf]  ;;  %v1609_v16 = vor.u32 %v1782_v3, %v1606_v4  ;;  %v1334_v17 = vld [vmem:[#allocation2 + $0x190] sm:$0xf0] }
  0x29   :  { %896 = vmatpush.bf16.msrb.mxu1 %v1385_v41  ;;  %865 = vmatmul.bf16.vlgmr.msra.gmra.mxu2 %v1867_v1  ;;  %v1714_v13 = vld [vmem:[#allocation2 + $0x184] sm:$0xf]  ;;  %v1875_v14 = vpack.c.b16 %v179_v5, %v179_v5  ;;  %v1877_v15 = vpack.c.b16 %v180_v7, %v180_v7  ;;  %v1462_v19 = vld [vmem:[#allocation2 + $0x290] sm:$0xf0]  ;;  %v1209_v22 = vor.u32 %v1682_v11, %v1206_v12  ;;  %v1729_v12 = vld [vmem:[#allocation2 + $0x1f4] sm:$0xf0] }
  0x2a   :  { %909 = vmatpush.bf16.msrb.mxu2 %v1513_v42  ;;  %v1746_v18 = vld [vmem:[#allocation2 + $0x284] sm:$0xf]  ;;  %v1590_v21 = vld [vmem:[#allocation2 + $0x390] sm:$0xf0]  ;;  %878 = vmatmul.bf16.vlgmr.msra.gmra.mxu3 %v1872_v6  ;;  %v1337_v23 = vor.u32 %v1714_v13, %v1334_v17  ;;  %v1516_v13 = vld [vmem:[#allocation2 + $0x2e8] sm:$0xf] }
  0x2b   :  { %922 = vmatpush.bf16.msrb.mxu3 %v1641_v46  ;;  %v1778_v20 = vld [vmem:[#allocation2 + $0x384] sm:$0xf]  ;;  %839 = vmatmul.bf16.vlgmr.msra.gmra.mxu0 %v1875_v14  ;;  %v1465_v24 = vor.u32 %v1746_v18, %v1462_v19  ;;  %v1190_v26 = vld [vmem:[#allocation2 + $0x70] sm:$0xf0]  ;;  %v1644_v19 = vld [vmem:[#allocation2 + $0x3e8] sm:$0xf] }
  0x2c   :  { %884 = vmatpush.bf16.msrb.mxu0 %v1241_v53  ;;  %852 = vmatmul.bf16.vlgmr.msra.gmra.mxu1 %v1877_v15  ;;  %v1678_v25 = vld [vmem:[#allocation2 + $0x64] sm:$0xf]  ;;  %v1593_v28 = vor.u32 %v1778_v20, %v1590_v21  ;;  %v1318_v29 = vld [vmem:[#allocation2 + $0x170] sm:$0xf0]  ;;  %v1793_v20 = vld [vmem:[#allocation2 + $0x3f4] sm:$0xf0] }
  0x2d   :  { %897 = vmatpush.bf16.msrb.mxu1 %v1369_v57  ;;  %v1710_v27 = vld [vmem:[#allocation2 + $0x164] sm:$0xf]  ;;  %v1446_v31 = vld [vmem:[#allocation2 + $0x270] sm:$0xf0]  ;;  %v1193_v34 = vor.u32 %v1678_v25, %v1190_v26  ;;  %v1244_v25 = vld [vmem:[#allocation2 + $0xc8] sm:$0xf] }
  0x2e   :  { %910 = vmatpush.bf16.msrb.mxu2 %v1497_v58  ;;  %v1742_v30 = vld [vmem:[#allocation2 + $0x264] sm:$0xf]  ;;  %v1574_v33 = vld [vmem:[#allocation2 + $0x370] sm:$0xf0]  ;;  %v1321_v35 = vor.u32 %v1710_v27, %v1318_v29  ;;  %v1693_v26 = vld [vmem:[#allocation2 + $0xd4] sm:$0xf0] }
  0x2f   :  { %923 = vmatpush.bf16.msrb.mxu3 %v1625_v62  ;;  %v1774_v32 = vld [vmem:[#allocation2 + $0x364] sm:$0xf]  ;;  %v1449_v36 = vor.u32 %v1742_v30, %v1446_v31  ;;  %v1174_v38 = vld [vmem:[#allocation2 + $0x50] sm:$0xf0]  ;;  %v1372_v27 = vld [vmem:[#allocation2 + $0x1c8] sm:$0xf] }
  0x30   :  { %885 = vmatpush.bf16.msrb.mxu0 %v1225_v8  ;;  %v1674_v37 = vld [vmem:[#allocation2 + $0x44] sm:$0xf]  ;;  %v1577_v40 = vor.u32 %v1774_v32, %v1574_v33  ;;  %v1302_v41 = vld [vmem:[#allocation2 + $0x150] sm:$0xf0]  ;;  %v1260_v8 = vld [vmem:[#allocation2 + $0xe8] sm:$0xf] }
  0x31   :  { %898 = vmatpush.bf16.msrb.mxu1 %v1353_v9  ;;  %v1706_v39 = vld [vmem:[#allocation2 + $0x144] sm:$0xf]  ;;  %v1430_v43 = vld [vmem:[#allocation2 + $0x250] sm:$0xf0]  ;;  %v1177_v46 = vor.u32 %v1674_v37, %v1174_v38  ;;  %v1697_v9 = vld [vmem:[#allocation2 + $0xf4] sm:$0xf0] }
  0x32   :  { %911 = vmatpush.bf16.msrb.mxu2 %v1481_v10  ;;  %v1738_v42 = vld [vmem:[#allocation2 + $0x244] sm:$0xf]  ;;  %v1558_v45 = vld [vmem:[#allocation2 + $0x350] sm:$0xf0]  ;;  %v1305_v47 = vor.u32 %v1706_v39, %v1302_v41  ;;  %v1388_v10 = vld [vmem:[#allocation2 + $0x1e8] sm:$0xf] }
  0x33   :  { %924 = vmatpush.bf16.msrb.mxu3 %v1609_v16  ;;  %v1770_v44 = vld [vmem:[#allocation2 + $0x344] sm:$0xf]  ;;  %v1433_v48 = vor.u32 %v1738_v42, %v1430_v43  ;;  %v1158_v50 = vld [vmem:[#allocation2 + $0x30] sm:$0xf0]  ;;  %v1761_v16 = vld [vmem:[#allocation2 + $0x2f4] sm:$0xf0] }
  0x34   :  { %886 = vmatpush.bf16.msrb.mxu0 %v1209_v22  ;;  %v1670_v49 = vld [vmem:[#allocation2 + $0x24] sm:$0xf]  ;;  %v1561_v52 = vor.u32 %v1770_v44, %v1558_v45  ;;  %v1286_v53 = vld [vmem:[#allocation2 + $0x130] sm:$0xf0]  ;;  %v1261_v22 = vor.u32 %v1697_v9, %v1260_v8  ;;  %v1725_v29 = vld [vmem:[#allocation2 + $0x1d4] sm:$0xf0] }
  0x35   :  { %899 = vmatpush.bf16.msrb.mxu1 %v1337_v23  ;;  %v1702_v51 = vld [vmem:[#allocation2 + $0x124] sm:$0xf]  ;;  %v1414_v55 = vld [vmem:[#allocation2 + $0x230] sm:$0xf0]  ;;  %v1161_v58 = vor.u32 %v1670_v49, %v1158_v50  ;;  %v1389_v23 = vor.u32 %v1729_v12, %v1388_v10  ;;  %v1500_v30 = vld [vmem:[#allocation2 + $0x2c8] sm:$0xf] }
  0x36   :  { %912 = vmatpush.bf16.msrb.mxu2 %v1465_v24  ;;  %v1734_v54 = vld [vmem:[#allocation2 + $0x224] sm:$0xf]  ;;  %v1542_v57 = vld [vmem:[#allocation2 + $0x330] sm:$0xf0]  ;;  %v1289_v61 = vor.u32 %v1702_v51, %v1286_v53  ;;  %v1517_v24 = vor.u32 %v1761_v16, %v1516_v13  ;;  %v1757_v31 = vld [vmem:[#allocation2 + $0x2d4] sm:$0xf0] }
  0x37   :  { %925 = vmatpush.bf16.msrb.mxu3 %v1593_v28  ;;  %v1766_v56 = vld [vmem:[#allocation2 + $0x324] sm:$0xf]  ;;  %v1142_v60 = vld [vmem:[#allocation2 + $0x10] sm:$0xf0]  ;;  %v1417_v62 = vor.u32 %v1734_v54, %v1414_v55  ;;  %v1645_v28 = vor.u32 %v1793_v20, %v1644_v19  ;;  %v1628_v32 = vld [vmem:[#allocation2 + $0x3c8] sm:$0xf] }
  0x38   :  { %887 = vmatpush.bf16.msrb.mxu0 %v1193_v34  ;;  %v1666_v59 = vld [vmem:[#allocation2 + $0x4] sm:$0xf]  ;;  %v1270_v0 = vld [vmem:[#allocation2 + $0x110] sm:$0xf0]  ;;  %v1545_v3 = vor.u32 %v1766_v56, %v1542_v57  ;;  %v1789_v33 = vld [vmem:[#allocation2 + $0x3d4] sm:$0xf0]  ;;  %v1245_v34 = vor.u32 %v1693_v26, %v1244_v25 }
  0x39   :  { %900 = vmatpush.bf16.msrb.mxu1 %v1321_v35  ;;  %v1698_v63 = vld [vmem:[#allocation2 + $0x104] sm:$0xf]  ;;  %v1398_v4 = vld [vmem:[#allocation2 + $0x210] sm:$0xf0]  ;;  %v1145_v11 = vor.u32 %v1666_v59, %v1142_v60  ;;  %v1373_v35 = vor.u32 %v1725_v29, %v1372_v27  ;;  %v1228_v37 = vld [vmem:[#allocation2 + $0xa8] sm:$0xf] }
  0x3a   :  { %913 = vmatpush.bf16.msrb.mxu2 %v1449_v36  ;;  %v1730_v2 = vld [vmem:[#allocation2 + $0x204] sm:$0xf]  ;;  %v1526_v7 = vld [vmem:[#allocation2 + $0x310] sm:$0xf0]  ;;  %v1273_v17 = vor.u32 %v1698_v63, %v1270_v0  ;;  %v1501_v36 = vor.u32 %v1757_v31, %v1500_v30  ;;  %v1689_v38 = vld [vmem:[#allocation2 + $0xb4] sm:$0xf0] }
  0x3b   :  { %926 = vmatpush.bf16.msrb.mxu3 %v1577_v40  ;;  %v1762_v5 = vld [vmem:[#allocation2 + $0x304] sm:$0xf]  ;;  %v1401_v18 = vor.u32 %v1730_v2, %v1398_v4  ;;  %v1356_v39 = vld [vmem:[#allocation2 + $0x1a8] sm:$0xf]  ;;  %v1629_v40 = vor.u32 %v1789_v33, %v1628_v32  ;;  %v1721_v41 = vld [vmem:[#allocation2 + $0x1b4] sm:$0xf0] }
  0x3c   :  { %888 = vmatpush.bf16.msrb.mxu0 %v1177_v46  ;;  %v1529_v21 = vor.u32 %v1762_v5, %v1526_v7  ;;  %v1484_v42 = vld [vmem:[#allocation2 + $0x2a8] sm:$0xf]  ;;  %v1753_v43 = vld [vmem:[#allocation2 + $0x2b4] sm:$0xf0]  ;;  %v1229_v46 = vor.u32 %v1689_v38, %v1228_v37 }
  0x3d   :  { %901 = vmatpush.bf16.msrb.mxu1 %v1305_v47  ;;  %v1612_v44 = vld [vmem:[#allocation2 + $0x3a8] sm:$0xf]  ;;  %v1785_v45 = vld [vmem:[#allocation2 + $0x3b4] sm:$0xf0]  ;;  %v1357_v47 = vor.u32 %v1721_v41, %v1356_v39 }
  0x3e   :  { %914 = vmatpush.bf16.msrb.mxu2 %v1433_v48  ;;  %v1485_v48 = vor.u32 %v1753_v43, %v1484_v42  ;;  %v1212_v49 = vld [vmem:[#allocation2 + $0x88] sm:$0xf]  ;;  %v1685_v50 = vld [vmem:[#allocation2 + $0x94] sm:$0xf0] }
  0x3f   :  { %927 = vmatpush.bf16.msrb.mxu3 %v1561_v52  ;;  %v1340_v51 = vld [vmem:[#allocation2 + $0x188] sm:$0xf]  ;;  %v1613_v52 = vor.u32 %v1785_v45, %v1612_v44  ;;  %v1717_v53 = vld [vmem:[#allocation2 + $0x194] sm:$0xf0] }
  0x40   :  { %889 = vmatpush.bf16.msrb.mxu0 %v1161_v58  ;;  %v1468_v54 = vld [vmem:[#allocation2 + $0x288] sm:$0xf]  ;;  %v1749_v55 = vld [vmem:[#allocation2 + $0x294] sm:$0xf0]  ;;  %v1213_v58 = vor.u32 %v1685_v50, %v1212_v49  ;;  %v1341_v59 = vor.u32 %v1717_v53, %v1340_v51  ;;  %v1390_v50 = vld [vmem:[#allocation2 + $0x1f8] sm:$0xf0] }
  0x41   :  { %902 = vmatpush.bf16.msrb.mxu1 %v1289_v61  ;;  %v1596_v56 = vld [vmem:[#allocation2 + $0x388] sm:$0xf]  ;;  %v1781_v57 = vld [vmem:[#allocation2 + $0x394] sm:$0xf0]  ;;  %v1469_v60 = vor.u32 %v1749_v55, %v1468_v54  ;;  %v1759_v51 = vld [vmem:[#allocation2 + $0x2ec] sm:$0xf] }
  0x42   :  { %915 = vmatpush.bf16.msrb.mxu2 %v1417_v62  ;;  %v1196_v61 = vld [vmem:[#allocation2 + $0x68] sm:$0xf]  ;;  %v1681_v62 = vld [vmem:[#allocation2 + $0x74] sm:$0xf0]  ;;  %v1597_v0 = vor.u32 %v1781_v57, %v1596_v56  ;;  %v1791_v55 = vld [vmem:[#allocation2 + $0x3ec] sm:$0xf] }
  0x43   :  { %928 = vmatpush.bf16.msrb.mxu3 %v1545_v3  ;;  %v1324_v63 = vld [vmem:[#allocation2 + $0x168] sm:$0xf]  ;;  %v1713_v2 = vld [vmem:[#allocation2 + $0x174] sm:$0xf0]  ;;  %v1197_v8 = vor.u32 %v1681_v62, %v1196_v61  ;;  %v1646_v56 = vld [vmem:[#allocation2 + $0x3f8] sm:$0xf0] }
  0x44   :  { %890 = vmatpush.bf16.msrb.mxu0 %v1145_v11  ;;  %v1452_v3 = vld [vmem:[#allocation2 + $0x268] sm:$0xf]  ;;  %v1745_v4 = vld [vmem:[#allocation2 + $0x274] sm:$0xf0]  ;;  %v1325_v9 = vor.u32 %v1713_v2, %v1324_v63  ;;  %v1691_v61 = vld [vmem:[#allocation2 + $0xcc] sm:$0xf] }
  0x45   :  { %903 = vmatpush.bf16.msrb.mxu1 %v1273_v17  ;;  %v1580_v5 = vld [vmem:[#allocation2 + $0x368] sm:$0xf]  ;;  %v1777_v7 = vld [vmem:[#allocation2 + $0x374] sm:$0xf0]  ;;  %v1453_v10 = vor.u32 %v1745_v4, %v1452_v3  ;;  %v1246_v62 = vld [vmem:[#allocation2 + $0xd8] sm:$0xf0] }
  0x46   :  { %916 = vmatpush.bf16.msrb.mxu2 %v1401_v18  ;;  %v1180_v11 = vld [vmem:[#allocation2 + $0x48] sm:$0xf]  ;;  %v1677_v12 = vld [vmem:[#allocation2 + $0x54] sm:$0xf0]  ;;  %v1581_v16 = vor.u32 %v1777_v7, %v1580_v5  ;;  %v1723_v63 = vld [vmem:[#allocation2 + $0x1cc] sm:$0xf] }
  0x47   :  { %929 = vmatpush.bf16.msrb.mxu3 %v1529_v21  ;;  %891 = vmatmul.bf16.vlgmr.msrb.gmra.mxu0 %v1875_v14  ;;  %v1308_v13 = vld [vmem:[#allocation2 + $0x148] sm:$0xf]  ;;  %v1709_v17 = vld [vmem:[#allocation2 + $0x154] sm:$0xf0]  ;;  %v1374_v2 = vld [vmem:[#allocation2 + $0x1d8] sm:$0xf0] }
  0x48   :  { %935 = vmatpush.bf16.msra.mxu0 %v1261_v22  ;;  %904 = vmatmul.bf16.vlgmr.msrb.gmra.mxu1 %v1877_v15  ;;  %v1436_v18 = vld [vmem:[#allocation2 + $0x248] sm:$0xf]  ;;  %v1741_v19 = vld [vmem:[#allocation2 + $0x254] sm:$0xf0]  ;;  %v1181_v22 = vor.u32 %v1677_v12, %v1180_v11  ;;  %v1755_v3 = vld [vmem:[#allocation2 + $0x2cc] sm:$0xf] }
  0x49   :  { %948 = vmatpush.bf16.msra.mxu1 %v1389_v23  ;;  %917 = vmatmul.bf16.vlgmr.msrb.gmra.mxu2 %v1867_v1  ;;  %v1564_v20 = vld [vmem:[#allocation2 + $0x348] sm:$0xf]  ;;  %v1773_v21 = vld [vmem:[#allocation2 + $0x354] sm:$0xf0]  ;;  %v1309_v23 = vor.u32 %v1709_v17, %v1308_v13  ;;  %v1502_v4 = vld [vmem:[#allocation2 + $0x2d8] sm:$0xf0] }
  0x4a   :  { %961 = vmatpush.bf16.msra.mxu2 %v1517_v24  ;;  %930 = vmatmul.bf16.vlgmr.msrb.gmra.mxu3 %v1872_v6  ;;  %v1437_v24 = vor.u32 %v1741_v19, %v1436_v18  ;;  %v1164_v25 = vld [vmem:[#allocation2 + $0x28] sm:$0xf]  ;;  %v1673_v26 = vld [vmem:[#allocation2 + $0x34] sm:$0xf0]  ;;  %v1787_v5 = vld [vmem:[#allocation2 + $0x3cc] sm:$0xf] }
  0x4b   :  { %974 = vmatpush.bf16.msra.mxu3 %v1645_v28  ;;  %v1292_v27 = vld [vmem:[#allocation2 + $0x128] sm:$0xf]  ;;  %v1565_v28 = vor.u32 %v1773_v21, %v1564_v20  ;;  %v1705_v29 = vld [vmem:[#allocation2 + $0x134] sm:$0xf0]  ;;  %v1630_v7 = vld [vmem:[#allocation2 + $0x3d8] sm:$0xf0] }
  0x4c   :  { %936 = vmatpush.bf16.msra.mxu0 %v1245_v34  ;;  %v1420_v30 = vld [vmem:[#allocation2 + $0x228] sm:$0xf]  ;;  %v1737_v31 = vld [vmem:[#allocation2 + $0x234] sm:$0xf0]  ;;  %v1165_v34 = vor.u32 %v1673_v26, %v1164_v25  ;;  %v1293_v37 = vor.u32 %v1705_v29, %v1292_v27  ;;  %v1687_v11 = vld [vmem:[#allocation2 + $0xac] sm:$0xf] }
  0x4d   :  { %949 = vmatpush.bf16.msra.mxu1 %v1373_v35  ;;  %v1548_v32 = vld [vmem:[#allocation2 + $0x328] sm:$0xf]  ;;  %v1769_v33 = vld [vmem:[#allocation2 + $0x334] sm:$0xf0]  ;;  %v1421_v38 = vor.u32 %v1737_v31, %v1420_v30  ;;  %v1230_v12 = vld [vmem:[#allocation2 + $0xb8] sm:$0xf0] }
  0x4e   :  { %962 = vmatpush.bf16.msra.mxu2 %v1501_v36  ;;  %v1148_v35 = vld [vmem:[#allocation2 + $0x8] sm:$0xf]  ;;  %v1669_v36 = vld [vmem:[#allocation2 + $0x14] sm:$0xf0]  ;;  %v1549_v42 = vor.u32 %v1769_v33, %v1548_v32  ;;  %v1719_v13 = vld [vmem:[#allocation2 + $0x1ac] sm:$0xf] }
  0x4f   :  { %975 = vmatpush.bf16.msra.mxu3 %v1629_v40  ;;  %v1276_v39 = vld [vmem:[#allocation2 + $0x108] sm:$0xf]  ;;  %v1701_v40 = vld [vmem:[#allocation2 + $0x114] sm:$0xf0]  ;;  %v1149_v49 = vor.u32 %v1669_v36, %v1148_v35  ;;  %v1358_v17 = vld [vmem:[#allocation2 + $0x1b8] sm:$0xf0] }
  0x50   :  { %937 = vmatpush.bf16.msra.mxu0 %v1229_v46  ;;  %v1404_v41 = vld [vmem:[#allocation2 + $0x208] sm:$0xf]  ;;  %v1733_v43 = vld [vmem:[#allocation2 + $0x214] sm:$0xf0]  ;;  %v1695_v46 = vld [vmem:[#allocation2 + $0xec] sm:$0xf]  ;;  %v1277_v53 = vor.u32 %v1701_v40, %v1276_v39 }
  0x51   :  { %950 = vmatpush.bf16.msra.mxu1 %v1357_v47  ;;  %v1532_v44 = vld [vmem:[#allocation2 + $0x308] sm:$0xf]  ;;  %v1765_v45 = vld [vmem:[#allocation2 + $0x314] sm:$0xf0]  ;;  %v1262_v47 = vld [vmem:[#allocation2 + $0xf8] sm:$0xf0]  ;;  %v1405_v54 = vor.u32 %v1733_v43, %v1404_v41 }
  0x52   :  { %963 = vmatpush.bf16.msra.mxu2 %v1485_v48  ;;  %v1727_v48 = vld [vmem:[#allocation2 + $0x1ec] sm:$0xf]  ;;  %v1533_v57 = vor.u32 %v1765_v45, %v1532_v44  ;;  %v1486_v19 = vld [vmem:[#allocation2 + $0x2b8] sm:$0xf0] }
  0x53   :  { %976 = vmatpush.bf16.msra.mxu3 %v1613_v52  ;;  %v1518_v52 = vld [vmem:[#allocation2 + $0x2f8] sm:$0xf0]  ;;  %v1751_v18 = vld [vmem:[#allocation2 + $0x2ac] sm:$0xf] }
  0x54   :  { %938 = vmatpush.bf16.msra.mxu0 %v1213_v58  ;;  %v1265_v58 = vor.u32 %v1695_v46, %v1262_v47  ;;  %v1783_v20 = vld [vmem:[#allocation2 + $0x3ac] sm:$0xf]  ;;  %v1614_v21 = vld [vmem:[#allocation2 + $0x3b8] sm:$0xf0] }
  0x55   :  { %951 = vmatpush.bf16.msra.mxu1 %v1341_v59  ;;  %v1393_v59 = vor.u32 %v1727_v48, %v1390_v50  ;;  %v1683_v25 = vld [vmem:[#allocation2 + $0x8c] sm:$0xf]  ;;  %v1214_v26 = vld [vmem:[#allocation2 + $0x98] sm:$0xf0] }
  0x56   :  { %964 = vmatpush.bf16.msra.mxu2 %v1469_v60  ;;  %v1521_v60 = vor.u32 %v1759_v51, %v1518_v52  ;;  %v1715_v27 = vld [vmem:[#allocation2 + $0x18c] sm:$0xf]  ;;  %v1342_v29 = vld [vmem:[#allocation2 + $0x198] sm:$0xf0] }
  0x57   :  { %977 = vmatpush.bf16.msra.mxu3 %v1597_v0  ;;  %v1649_v0 = vor.u32 %v1791_v55, %v1646_v56  ;;  %v1747_v30 = vld [vmem:[#allocation2 + $0x28c] sm:$0xf]  ;;  %v1470_v31 = vld [vmem:[#allocation2 + $0x298] sm:$0xf0]  ;;  %v1345_v35 = vor.u32 %v1715_v27, %v1342_v29  ;;  %v1796_v27 = vld [vmem:[%s1936_s3 + $0xc] sm:$0xf0] }
  0x58   :  { %939 = vmatpush.bf16.msra.mxu0 %v1197_v8  ;;  %v1249_v8 = vor.u32 %v1691_v61, %v1246_v62  ;;  %v1779_v32 = vld [vmem:[#allocation2 + $0x38c] sm:$0xf]  ;;  %v1598_v33 = vld [vmem:[#allocation2 + $0x398] sm:$0xf0]  ;;  %v1473_v36 = vor.u32 %v1747_v30, %v1470_v31  ;;  %v1794_v30 = vld [vmem:[%s1936_s3 + $0x4] sm:$0xf] }
  0x59   :  { %952 = vmatpush.bf16.msra.mxu1 %v1325_v9  ;;  %v1377_v9 = vor.u32 %v1723_v63, %v1374_v2  ;;  %v1711_v39 = vld [vmem:[#allocation2 + $0x16c] sm:$0xf]  ;;  %v1601_v40 = vor.u32 %v1779_v32, %v1598_v33  ;;  %v1326_v41 = vld [vmem:[#allocation2 + $0x178] sm:$0xf0]  ;;  %v1654_v31 = vld [vmem:[%s1936_s3 + $0x10] sm:$0xf0] }
  0x5a   :  { %965 = vmatpush.bf16.msra.mxu2 %v1453_v10  ;;  %v1505_v10 = vor.u32 %v1755_v3, %v1502_v4  ;;  %v1454_v43 = vld [vmem:[#allocation2 + $0x278] sm:$0xf0]  ;;  %v1775_v44 = vld [vmem:[#allocation2 + $0x36c] sm:$0xf]  ;;  %v1329_v47 = vor.u32 %v1711_v39, %v1326_v41  ;;  %v1657_v32 = vor.u32 %v1794_v30, %v1654_v31 }
  0x5b   :  { %978 = vmatpush.bf16.msra.mxu3 %v1581_v16  ;;  %v1633_v16 = vor.u32 %v1787_v5, %v1630_v7  ;;  %v1582_v45 = vld [vmem:[#allocation2 + $0x378] sm:$0xf0]  ;;  %v1707_v51 = vld [vmem:[#allocation2 + $0x14c] sm:$0xf] }
  0x5c   :  { %940 = vmatpush.bf16.msra.mxu0 %v1181_v22  ;;  %v1233_v22 = vor.u32 %v1687_v11, %v1230_v12  ;;  %v1182_v50 = vld [vmem:[#allocation2 + $0x58] sm:$0xf0]  ;;  %v1585_v52 = vor.u32 %v1775_v44, %v1582_v45  ;;  %v1771_v56 = vld [vmem:[#allocation2 + $0x34c] sm:$0xf] }
  0x5d   :  { %953 = vmatpush.bf16.msra.mxu1 %v1309_v23  ;;  %v1361_v23 = vor.u32 %v1719_v13, %v1358_v17  ;;  %v1438_v55 = vld [vmem:[#allocation2 + $0x258] sm:$0xf0]  ;;  %v1671_v61 = vld [vmem:[#allocation2 + $0x2c] sm:$0xf] }
  0x5e   :  { %966 = vmatpush.bf16.msra.mxu2 %v1437_v24  ;;  %v1489_v24 = vor.u32 %v1751_v18, %v1486_v19  ;;  %v1166_v62 = vld [vmem:[#allocation2 + $0x38] sm:$0xf0]  ;;  %v1703_v63 = vld [vmem:[#allocation2 + $0x12c] sm:$0xf] }
  0x5f   :  { %979 = vmatpush.bf16.msra.mxu3 %v1565_v28  ;;  %v1617_v28 = vor.u32 %v1783_v20, %v1614_v21  ;;  %v1294_v2 = vld [vmem:[#allocation2 + $0x138] sm:$0xf0]  ;;  %v1735_v3 = vld [vmem:[#allocation2 + $0x22c] sm:$0xf] }
  0x60   :  { %941 = vmatpush.bf16.msra.mxu0 %v1165_v34  ;;  %v1217_v34 = vor.u32 %v1683_v25, %v1214_v26  ;;  %v1422_v4 = vld [vmem:[#allocation2 + $0x238] sm:$0xf0]  ;;  %v1767_v5 = vld [vmem:[#allocation2 + $0x32c] sm:$0xf]  ;;  %v1652_v26 = vld [vmem:[%s1936_s3] sm:$0xf] }
  0x61   :  { %954 = vmatpush.bf16.msra.mxu1 %v1293_v37  ;;  %v1679_v37 = vld [vmem:[#allocation2 + $0x6c] sm:$0xf]  ;;  %v1550_v7 = vld [vmem:[#allocation2 + $0x338] sm:$0xf0] }
  0x62   :  { %967 = vmatpush.bf16.msra.mxu2 %v1421_v38  ;;  %v1198_v38 = vld [vmem:[#allocation2 + $0x78] sm:$0xf0]  ;;  %v1667_v11 = vld [vmem:[#allocation2 + $0xc] sm:$0xf] }
  0x63   :  { %980 = vmatpush.bf16.msra.mxu3 %v1549_v42  ;;  %v1743_v42 = vld [vmem:[#allocation2 + $0x26c] sm:$0xf]  ;;  %v1201_v46 = vor.u32 %v1679_v37, %v1198_v38  ;;  %v1150_v12 = vld [vmem:[#allocation2 + $0x18] sm:$0xf0] }
  0x64   :  { %942 = vmatpush.bf16.msra.mxu0 %v1149_v49  ;;  %v1457_v48 = vor.u32 %v1743_v42, %v1454_v43  ;;  %v1675_v49 = vld [vmem:[#allocation2 + $0x4c] sm:$0xf]  ;;  %v1278_v17 = vld [vmem:[#allocation2 + $0x118] sm:$0xf0] }
  0x65   :  { %955 = vmatpush.bf16.msra.mxu1 %v1277_v53  ;;  %v1310_v53 = vld [vmem:[#allocation2 + $0x158] sm:$0xf0]  ;;  %v1699_v13 = vld [vmem:[#allocation2 + $0x10c] sm:$0xf] }
  0x66   :  { %968 = vmatpush.bf16.msra.mxu2 %v1405_v54  ;;  %v1739_v54 = vld [vmem:[#allocation2 + $0x24c] sm:$0xf]  ;;  %v1406_v19 = vld [vmem:[#allocation2 + $0x218] sm:$0xf0] }
  0x67   :  { %981 = vmatpush.bf16.msra.mxu3 %v1533_v57  ;;  %943 = vmatmul.bf16.vlgmr.msra.gmra.mxu0 %v1875_v14  ;;  %v1566_v57 = vld [vmem:[#allocation2 + $0x358] sm:$0xf0]  ;;  %v1731_v18 = vld [vmem:[#allocation2 + $0x20c] sm:$0xf] }
  0x68   :  { %987 = vmatpush.bf16.msrb.mxu0 %v1265_v58  ;;  %956 = vmatmul.bf16.vlgmr.msra.gmra.mxu1 %v1877_v15  ;;  %v1185_v58 = vor.u32 %v1675_v49, %v1182_v50  ;;  %v1763_v20 = vld [vmem:[#allocation2 + $0x30c] sm:$0xf]  ;;  %v1534_v21 = vld [vmem:[#allocation2 + $0x318] sm:$0xf0]  ;;  %v1660_v49 = vld [vmem:[%s1936_s3 + $0x8] sm:$0xf] }
  0x69   :  { %1000 = vmatpush.bf16.msrb.mxu1 %v1393_v59  ;;  %969 = vmatmul.bf16.vlgmr.msra.gmra.mxu2 %v1867_v1  ;;  %v1313_v59 = vor.u32 %v1707_v51, %v1310_v53  ;;  %v1537_v25 = vor.u32 %v1763_v20, %v1534_v21  ;;  %v1797_v50 = vld [vmem:[%s1936_s3 + $0x14] sm:$0xf0] }
  0x6a   :  { %1013 = vmatpush.bf16.msrb.mxu2 %v1521_v60  ;;  %982 = vmatmul.bf16.vlgmr.msra.gmra.mxu3 %v1872_v6  ;;  %v1441_v60 = vor.u32 %v1739_v54, %v1438_v55 }
  0x6b   :  { %1026 = vmatpush.bf16.msrb.mxu3 %v1649_v0  ;;  %v1569_v0 = vor.u32 %v1771_v56, %v1566_v57 }
  0x6c   :  { %988 = vmatpush.bf16.msrb.mxu0 %v1249_v8  ;;  %v1169_v8 = vor.u32 %v1671_v61, %v1166_v62  ;;  %v1662_v61 = vld [vmem:[%s1936_s3 + $0x18] sm:$0xf0] }
  0x6d   :  { %1001 = vmatpush.bf16.msrb.mxu1 %v1377_v9  ;;  %v1297_v9 = vor.u32 %v1703_v63, %v1294_v2 }
  0x6e   :  { %1014 = vmatpush.bf16.msrb.mxu2 %v1505_v10  ;;  %v1425_v10 = vor.u32 %v1735_v3, %v1422_v4 }
  0x6f   :  { %1027 = vmatpush.bf16.msrb.mxu3 %v1633_v16  ;;  %v1553_v16 = vor.u32 %v1767_v5, %v1550_v7 }
  0x70   :  { %989 = vmatpush.bf16.msrb.mxu0 %v1233_v22  ;;  %v1153_v22 = vor.u32 %v1667_v11, %v1150_v12 }
  0x71   :  { %1002 = vmatpush.bf16.msrb.mxu1 %v1361_v23  ;;  %v1281_v23 = vor.u32 %v1699_v13, %v1278_v17 }
  0x72   :  { %1015 = vmatpush.bf16.msrb.mxu2 %v1489_v24  ;;  %v1409_v24 = vor.u32 %v1731_v18, %v1406_v19 }
  0x73   :  { %1028 = vmatpush.bf16.msrb.mxu3 %v1617_v28  ;;  %v1653_v28 = vor.u32 %v1796_v27, %v1652_v26 }
  0x74   :  { %990 = vmatpush.bf16.msrb.mxu0 %v1217_v34 }
  0x75   :  { %1003 = vmatpush.bf16.msrb.mxu1 %v1345_v35 }
  0x76   :  { %1016 = vmatpush.bf16.msrb.mxu2 %v1473_v36 }
  0x77   :  { %1029 = vmatpush.bf16.msrb.mxu3 %v1601_v40 }
  0x78   :  { %991 = vmatpush.bf16.msrb.mxu0 %v1201_v46 }
  0x79   :  { %1004 = vmatpush.bf16.msrb.mxu1 %v1329_v47 }
  0x7a   :  { %1017 = vmatpush.bf16.msrb.mxu2 %v1457_v48 }
  0x7b   :  { %1030 = vmatpush.bf16.msrb.mxu3 %v1585_v52  ;;  %v1661_v52 = vor.u32 %v1797_v50, %v1660_v49 }
  0x7c   :  { %992 = vmatpush.bf16.msrb.mxu0 %v1185_v58 }
  0x7d   :  { %1005 = vmatpush.bf16.msrb.mxu1 %v1313_v59 }
  0x7e   :  { %1018 = vmatpush.bf16.msrb.mxu2 %v1441_v60  ;;  %v1795_v60 = vld [vmem:[%s1936_s3 + $0xc] sm:$0xf] }
  0x7f   :  { %1031 = vmatpush.bf16.msrb.mxu3 %v1569_v0  ;;  %v1665_v63 = vor.u32 %v1795_v60, %v1662_v61 }
  0x80   :  { %993 = vmatpush.bf16.msrb.mxu0 %v1169_v8 }
  0x81   :  { %1006 = vmatpush.bf16.msrb.mxu1 %v1297_v9 }
  0x82   :  { %1019 = vmatpush.bf16.msrb.mxu2 %v1425_v10 }
  0x83   :  { %1032 = vmatpush.bf16.msrb.mxu3 %v1553_v16 }
  0x84   :  { %994 = vmatpush.bf16.msrb.mxu0 %v1153_v22 }
  0x85   :  { %1007 = vmatpush.bf16.msrb.mxu1 %v1281_v23 }
  0x86   :  { %1020 = vmatpush.bf16.msrb.mxu2 %v1409_v24 }
  0x87   :  { %1033 = vmatpush.bf16.msrb.mxu3 %v1537_v25  ;;  %995 = vmatmul.bf16.vlgmr.msrb.gmra.mxu0 %v1875_v14  ;;  %v1903_v14 = vld [vmem:[%s1935_s2] sm:$0xf] }
  0x88   :  { %1008 = vmatmul.bf16.vlgmr.msrb.gmra.mxu1 %v1877_v15  ;;  %1082 = vmatpush.bf16.xpose.msra.mxu0 %v1653_v28  ;;  %v169_v15 = vperm.slane %v1903_v14, 0  ;;  %v170_v44 = vperm.slane %v1903_v14, 1  ;;  %v171_v2 = vperm.slane %v1903_v14, 2  ;;  %v172_v20 = vperm.slane %v1903_v14, 3 }
  0x89   :  { %1021 = vmatmul.bf16.vlgmr.msrb.gmra.mxu2 %v1867_v1  ;;  %1095 = vmatpush.bf16.xpose.msra.mxu1 %v1657_v32 }
  0x8a   :  { %1034 = vmatmul.bf16.vlgmr.msrb.gmra.mxu3 %v1872_v6  ;;  %1108 = vmatpush.bf16.xpose.msra.mxu2 %v1661_v52 }
  0x8b   :  { %1121 = vmatpush.bf16.xpose.msra.mxu3 %v1665_v63 }
  0xa8   :  { %v840_v1 = vpop.f32.mrf.mxu0 }
  0xa9   :  { %v841_v29 = vadd.f32 %v840_v1, %v169_v15  ;;  %v853_v6 = vpop.f32.mrf.mxu1 }
  0xab   :  { %v854_v33 = vadd.f32 %v853_v6, %v841_v29 }
  0xac   :  { %v866_v34 = vpop.f32.mrf.mxu2 }
  0xad   :  { %v867_v35 = vadd.f32 %v866_v34, %v854_v33  ;;  %v879_v36 = vpop.f32.mrf.mxu3 }
  0xaf   :  { %v880_v37 = vadd.f32 %v879_v36, %v867_v35 }
  0xb0   :  { %v842_v38 = vpop.f32.mrf.mxu0 }
  0xb1   :  { %v1039_v39 = vmax.f32 %v880_v37, 0.0  ;;  %v855_v40 = vpop.f32.mrf.mxu1  ;;  %v1801_v37 = vld [vmem:[%s1937_s4] ss:$0 sm:$0xff]  ;;  %v1127_v38 = vlaneseq }
  0xb3   :  { %v1043_v41 = vpack.c.bf16 %v1039_v39, %v1039_v39  ;;  %v1128_v40 = vshrl.u32 %v1127_v38, 7 }
  0xb4   :  { %v868_v42 = vpop.f32.mrf.mxu2 }
  0xb5   :  { %1083 = vmatmul.bf16.vlgmr.msra.gmra.mxu0 %v1043_v41  ;;  %v881_v43 = vpop.f32.mrf.mxu3  ;;  %vm1129_vm0 = vcmp.lt.s32.totalorder %v1128_v40, 4 }
  0xc4   :  { %v892_v45 = vpop.f32.mrf.mxu0 }
  0xc5   :  { %v893_v46 = vadd.f32 %v892_v45, %v170_v44  ;;  %v905_v47 = vpop.f32.mrf.mxu1 }
  0xc7   :  { %v906_v48 = vadd.f32 %v905_v47, %v893_v46 }
  0xcc   :  { %v918_v51 = vpop.f32.mrf.mxu2  ;;  %v894_v56 = vpop.f32.mrf.mxu0 }
  0xcd   :  { %v919_v53 = vadd.f32 %v918_v51, %v906_v48  ;;  %v931_v54 = vpop.f32.mrf.mxu3  ;;  %v907_v57 = vpop.f32.mrf.mxu1 }
  0xcf   :  { %v932_v55 = vadd.f32 %v931_v54, %v919_v53 }
  0xd1   :  { %v1040_v58 = vmax.f32 %v932_v55, 0.0 }
  0xd3   :  { %v1044_v59 = vpack.c.bf16 %v1040_v58, %v1040_v58 }
  0xd4   :  { %v920_v62 = vpop.f32.mrf.mxu2 }
  0xd5   :  { %1096 = vmatmul.bf16.vlgmr.msra.gmra.mxu1 %v1044_v59  ;;  %v933_v0 = vpop.f32.mrf.mxu3 }
  0xe4   :  { %v944_v3 = vpop.f32.mrf.mxu0 }
  0xe5   :  { %v945_v4 = vadd.f32 %v944_v3, %v171_v2  ;;  %v957_v5 = vpop.f32.mrf.mxu1 }
  0xe7   :  { %v958_v7 = vadd.f32 %v957_v5, %v945_v4 }
  0xec   :  { %v970_v8 = vpop.f32.mrf.mxu2  ;;  %v946_v12 = vpop.f32.mrf.mxu0 }
  0xed   :  { %v971_v9 = vadd.f32 %v970_v8, %v958_v7  ;;  %v983_v10 = vpop.f32.mrf.mxu3  ;;  %v959_v13 = vpop.f32.mrf.mxu1 }
  0xef   :  { %v984_v11 = vadd.f32 %v983_v10, %v971_v9 }
  0xf1   :  { %v1041_v16 = vmax.f32 %v984_v11, 0.0 }
  0xf3   :  { %v1045_v17 = vpack.c.bf16 %v1041_v16, %v1041_v16 }
  0xf4   :  { %v972_v18 = vpop.f32.mrf.mxu2 }
  0xf5   :  { %1109 = vmatmul.bf16.vlgmr.msra.gmra.mxu2 %v1045_v17  ;;  %v985_v19 = vpop.f32.mrf.mxu3 }
 0x104   :  { %v996_v21 = vpop.f32.mrf.mxu0 }
 0x105   :  { %v997_v22 = vadd.f32 %v996_v21, %v172_v20  ;;  %v1009_v23 = vpop.f32.mrf.mxu1 }
 0x107   :  { %v1010_v24 = vadd.f32 %v1009_v23, %v997_v22 }
 0x10c   :  { %v1022_v25 = vpop.f32.mrf.mxu2  ;;  %v998_v28 = vpop.f32.mrf.mxu0 }
 0x10d   :  { %v1023_v26 = vadd.f32 %v1022_v25, %v1010_v24  ;;  %v1035_v27 = vpop.f32.mrf.mxu3  ;;  %v1011_v15 = vpop.f32.mrf.mxu1 }
 0x10f   :  { %v1036_v1 = vadd.f32 %v1035_v27, %v1023_v26 }
 0x111   :  { %v1042_v29 = vmax.f32 %v1036_v1, 0.0 }
 0x113   :  { %v1046_v6 = vpack.c.bf16 %v1042_v29, %v1042_v29 }
 0x114   :  { %v1024_v30 = vpop.f32.mrf.mxu2 }
 0x115   :  { %v1037_v31 = vpop.f32.mrf.mxu3  ;;  %1122 = vmatmul.bf16.vlgmr.msra.gmra.mxu3 %v1046_v6 }
 0x132   :  { %v1084_v32 = vpop.f32.mrf.mxu0 }
 0x133   :  { %v1085_v39 = vadd.f32 %v1801_v37, %v1084_v32 }
 0x13a   :  { %v1086_v33 = vpop.f32.mrf.mxu0 }
 0x152   :  { %v1097_v34 = vpop.f32.mrf.mxu1 }
 0x153   :  { %v1098_v41 = vadd.f32 %v1097_v34, %v1085_v39 }
 0x15a   :  { %v1099_v35 = vpop.f32.mrf.mxu1 }
 0x178   :  { %v1110_v14 = vpop.f32.mrf.mxu2 }
 0x179   :  { %v1111_v42 = vadd.f32 %v1110_v14, %v1098_v41 }
 0x180   :  { %v1112_v36 = vpop.f32.mrf.mxu2 }
 0x198   :  { %v1123_v43 = vpop.f32.mrf.mxu3 }
 0x199   :  { %v1124_v44 = vadd.f32 %v1123_v43, %v1111_v42 }
 0x19b   :  { %v1130_v45 = vsel %vm1129_vm0, %v1124_v44, 0.0 }
 0x19c   :  { %1132 = vst.msk [vmem:[%s1938_s5] sm:$0xff] %vm1131_vm1, %v1130_v45 }
 0x1a0   :  { %v1125_v46 = vpop.f32.mrf.mxu3 }
 0x1a1   :  { %1137 = vsyncpa [#allocation3], 1 }

</bundles_post_ra>
